<compile_context>
chip_gen: v6e
topology: v6e:2x2x1
jax: 0.10.0
libtpu: 0.0.40
codegen_flags: <defaults>
</compile_context>

<pallas_src>
import jax
import jax.numpy as jnp
from jax.experimental import pallas as pl
from jax.experimental.pallas import tpu as pltpu

INIT_NORM_STD = 0.02


def _round_up(x, m):
    return ((x + m - 1) // m) * m


def _choose_tm(m):
    """Row-tile size: big tiles (HBM/overhead-bound kernel), even >=2 steps if possible."""
    candidates = (1024, 512, 256, 128, 64, 32, 16)
    # Prefer: no padding waste AND an even number of grid steps (v7x 2-TC balance).
    for tm in candidates:
        if m % tm == 0 and (m // tm) >= 2 and (m // tm) % 2 == 0:
            return tm
    # Next best: even number of steps, some padding.
    for tm in candidates:
        steps = pl.cdiv(m, tm)
        if steps >= 2 and steps % 2 == 0:
            return tm
    # M too small to split into >=2 tiles of >=16 rows: single grid step.
    return min(512, _round_up(m, 16))


# ---------------------------------------------------------------------------
# Pallas kernel: patch projection + fused (pos + scale) embedding gather
# ---------------------------------------------------------------------------
def embeddings_kernel(x_ref, w_ref, idx_ref, tab_ref, o_ref):
    tm = x_ref.shape[0]
    n_tab = tab_ref.shape[0]

    # Patch projection on the MXU (bf16 operands, f32 accumulation).
    acc = jnp.dot(x_ref[...], w_ref[...], preferred_element_type=jnp.float32)

    # Fused embedding gathers: one bf16 one-hot matmul against the combined
    # (pos ++ scale) table.  Each row has exactly two 1s -> result is
    # pos_emb[pidx] + scale_emb[sidx] (conv bias pre-folded into the pos rows).
    # One-hot values are exact in bf16; the table is bf16 (within tolerance of
    # the bf16 x/w path), so this is a single native-MXU pass.
    # NOTE: this one-hot gather is only a win while n_tab is small (hundreds);
    # for very large position grids switch to a pre-gathered (M, D) input or a
    # scalar-prefetch / DMA row-gather instead.
    pidx = idx_ref[:, 0:1]                                  # (tm, 1) int32, pos row
    sidx = idx_ref[:, 1:2]                                  # (tm, 1) int32, n_pos + scale row
    cols = jax.lax.broadcasted_iota(jnp.int32, (tm, n_tab), 1)
    oh = ((pidx == cols) | (sidx == cols)).astype(jnp.bfloat16)
    acc = acc + jnp.dot(oh, tab_ref[...], preferred_element_type=jnp.float32)

    o_ref[...] = acc.astype(o_ref.dtype)


def patch_embed_pallas(x_flat, w_flat, idx, table, *, tm, out_dtype=jnp.float32):
    m, k = x_flat.shape
    d = w_flat.shape[1]
    n_tab = table.shape[0]
    assert m % tm == 0 and tm % 16 == 0, (m, tm)        # bf16 sublane packing
    assert k % 128 == 0 and d % 128 == 0, (k, d)        # lane-dense loads/stores
    grid = (m // tm,)

    # Explicit VMEM budget: account for 2x double-buffering of every input/output
    # (conservative even for the constant-index resident weight/table), plus
    # headroom.  Keeps us inside v7x's 64 MiB physical / 32 MiB scoped default
    # while permitting larger row tiles on v5e/v6e.
    resident_bytes = (k * d + n_tab * d) * 2             # bf16 weight + fused table
    per_step_bytes = tm * k * 2 + tm * 2 * 4 + tm * d * 4
    vmem_limit = int(min(max(2 * (resident_bytes + per_step_bytes) + (8 << 20),
                             32 << 20), 120 << 20))

    return pl.pallas_call(
        embeddings_kernel,
        out_shape=jax.ShapeDtypeStruct((m, d), out_dtype),
        grid_spec=pltpu.PrefetchScalarGridSpec(
            num_scalar_prefetch=0,
            grid=grid,
            in_specs=[
                pl.BlockSpec((tm, k), lambda i: (i, 0)),      # patch rows (tiled)
                pl.BlockSpec((k, d), lambda i: (0, 0)),       # weight (VMEM-resident)
                pl.BlockSpec((tm, 2), lambda i: (i, 0)),      # per-row [pos, scale] indices
                pl.BlockSpec((n_tab, d), lambda i: (0, 0)),   # fused pos+scale table (resident)
            ],
            out_specs=pl.BlockSpec((tm, d), lambda i: (i, 0)),
        ),
        compiler_params=pltpu.CompilerParams(
            dimension_semantics=("parallel",),                # pipelines; shards across v7x TCs
            vmem_limit_bytes=vmem_limit),
    )(x_flat, w_flat, idx, table)


# ---------------------------------------------------------------------------
# Parameter construction (deterministic, synthetic -- matches __init__ shapes)
# ---------------------------------------------------------------------------
def init_params(key, hidden, patch, img_dim, num_extra_tokens, num_scales):
    width = img_dim // patch
    ks = jax.random.split(key, 6)
    return {
        "conv_w": jax.random.normal(ks[0], (hidden, 3, patch, patch), jnp.float32) * INIT_NORM_STD,
        "conv_b": jax.random.normal(ks[1], (hidden,), jnp.float32) * INIT_NORM_STD,
        "cls_token": jax.random.normal(ks[2], (1, 1, hidden), jnp.float32) * INIT_NORM_STD,
        "extra_tokens": jax.random.normal(ks[3], (1, num_extra_tokens, hidden), jnp.float32) * INIT_NORM_STD,
        "pos_emb": jax.random.normal(ks[4], (1, width * width + 1, hidden), jnp.float32) * INIT_NORM_STD,
        "scale_emb": jax.random.normal(ks[5], (1, num_scales + 1, hidden), jnp.float32) * INIT_NORM_STD,
    }


# ---------------------------------------------------------------------------
# One-time parameter preprocessing (hoisted out of the per-call hot path)
# ---------------------------------------------------------------------------
def preprocess_params(p):
    hidden = p["conv_w"].shape[0]
    k = p["conv_w"].shape[1] * p["conv_w"].shape[2] * p["conv_w"].shape[3]

    w_flat = p["conv_w"].reshape(hidden, k).T                       # (K, hidden)
    pos_table = p["pos_emb"][0] + p["conv_b"][None, :]              # fold conv bias (once per row)
    scl_table = p["scale_emb"][0]
    table = jnp.concatenate([pos_table, scl_table], axis=0)         # (n_pos + n_scl, hidden)

    d_pad = _round_up(hidden, 128)                                  # lane-dense output stores
    k_pad = _round_up(k, 128)                                       # lane-dense x loads / MXU cadence
    if d_pad != hidden:
        w_flat = jnp.pad(w_flat, ((0, 0), (0, d_pad - hidden)))
        table = jnp.pad(table, ((0, 0), (0, d_pad - hidden)))
    if k_pad != k:
        w_flat = jnp.pad(w_flat, ((0, k_pad - k), (0, 0)))

    return {
        "w_flat": w_flat.astype(jnp.bfloat16),                      # (K_pad, D_pad) bf16
        "table": table.astype(jnp.bfloat16),                        # (n_pos+n_scl, D_pad) bf16
        "cls_plus_pos0": p["cls_token"] + p["pos_emb"][:, 0],       # (1, 1, hidden)
        "extra_tokens": p["extra_tokens"],                          # (1, E, hidden)
    }


# ---------------------------------------------------------------------------
# Forward (glue + Pallas hot path).  Mirrors Embeddings.forward with
# use_cls_token=True, use_patch_embedding=True, use_pos_embedding=True,
# num_extra_tokens>0, num_scales>1, dropout p=0 (identity).
# ---------------------------------------------------------------------------
def embeddings_forward(prep, x, pos, scales, *, n_pos, num_scales, width_pos):
    B, N, C, P, _ = x.shape
    hidden = prep["cls_plus_pos0"].shape[-1]
    M = B * N
    K = C * P * P
    K_pad, D = prep["w_flat"].shape

    # Conv2d(kernel=stride=P) == per-patch matmul; pad K up to a multiple of 128.
    x_flat = x.reshape(M, K).astype(jnp.bfloat16)
    if K_pad != K:
        x_flat = jnp.pad(x_flat, ((0, 0), (0, K_pad - K)))

    # UvPosEmbedding / ScaleEmbedding index math (cheap glue; gathers fused in-kernel).
    pos_f = jnp.floor(pos.reshape(M, 2) * width_pos)
    pidx = (pos_f[:, 0] * width_pos + pos_f[:, 1] + 1.0).astype(jnp.int32)
    pidx = jnp.clip(pidx, 1, n_pos - 1)                    # guard pos == 1.0 edge
    sidx = (jnp.clip(scales.reshape(M), 0, num_scales - 1) + 1).astype(jnp.int32) + n_pos
    idx = jnp.stack([pidx, sidx], axis=1)                  # (M, 2) int32

    # Row tiling / padding.
    TM = _choose_tm(M)
    M_pad = _round_up(M, TM)
    if M_pad != M:
        x_flat = jnp.pad(x_flat, ((0, M_pad - M), (0, 0)))
        idx = jnp.pad(idx, ((0, M_pad - M), (0, 0)))

    out = patch_embed_pallas(x_flat, prep["w_flat"], idx, prep["table"], tm=TM)

    # Skip the extra copy when no padding was introduced.
    if M_pad != M or D != hidden:
        out = out[:M, :hidden]
    x_seq = out.reshape(B, N, hidden)

    # forward_tokens: cls token (+ positional row 0) and extra tokens, then concat.
    cls = jnp.broadcast_to(prep["cls_plus_pos0"], (B, 1, hidden))
    extra = jnp.broadcast_to(prep["extra_tokens"],
                             (B, prep["extra_tokens"].shape[1], hidden))
    # dropout(p=0.0) is identity.
    return jnp.concatenate([cls, extra, x_seq], axis=1)    # (B, 1+extra+N, hidden)


# ---------------------------------------------------------------------------
# Plain-JAX reference (mirrors the PyTorch module) for a correctness check.
# ---------------------------------------------------------------------------
def embeddings_reference(p, x, pos, scales, *, num_scales, width_pos):
    B, N, C, P, _ = x.shape
    hidden = p["conv_w"].shape[0]
    M = B * N
    K = C * P * P
    proj = x.reshape(M, K) @ p["conv_w"].reshape(hidden, K).T + p["conv_b"][None, :]
    pos_f = jnp.floor(pos.reshape(M, 2) * width_pos)
    pidx = (pos_f[:, 0] * width_pos + pos_f[:, 1] + 1.0).astype(jnp.int32)
    pidx = jnp.clip(pidx, 1, p["pos_emb"].shape[1] - 1)
    sidx = (jnp.clip(scales.reshape(M), 0, num_scales - 1) + 1).astype(jnp.int32)
    proj = proj + p["pos_emb"][0, pidx] + p["scale_emb"][0, sidx]
    x_seq = proj.reshape(B, N, hidden)
    cls = jnp.broadcast_to(p["cls_token"] + p["pos_emb"][:, 0], (B, 1, hidden))
    extra = jnp.broadcast_to(p["extra_tokens"],
                             (B, p["extra_tokens"].shape[1], hidden))
    return jnp.concatenate([cls, extra, x_seq], axis=1)


# ---------------------------------------------------------------------------
if __name__ == "__main__":
    # Config consistent with the module: hidden_size=32, patch_size=4, img_dim=16.
    B, N, C, P = 2, 8, 3, 4
    hidden, img_dim = 32, 16
    num_scales, num_extra_tokens = 2, 2
    width_pos = img_dim // P   # 4

    key = jax.random.PRNGKey(0)
    kp, kx, kpos, ks = jax.random.split(key, 4)

    params = init_params(kp, hidden, P, img_dim, num_extra_tokens, num_scales)
    prep = preprocess_params(params)                       # one-time, off the hot path
    n_pos = params["pos_emb"].shape[1]                     # width^2 + 1 = 17

    x = jax.random.normal(kx, (B, N, C, P, P), jnp.float32)     # patches, NCHW per patch
    pos = jax.random.uniform(kpos, (B, N, 2), jnp.float32)      # uv coords in [0, 1)
    scales = jax.random.uniform(ks, (B, N), jnp.float32) * num_scales

    fwd = jax.jit(embeddings_forward,
                  static_argnames=("n_pos", "num_scales", "width_pos"))
    out = fwd(prep, x, pos, scales,
              n_pos=n_pos, num_scales=num_scales, width_pos=width_pos)
    out = jax.block_until_ready(out)

    expected_seq = 1 + num_extra_tokens + N
    assert out.shape == (B, expected_seq, hidden), out.shape
    assert out.dtype == jnp.float32

    ref = embeddings_reference(params, x, pos, scales,
                               num_scales=num_scales, width_pos=width_pos)
    err = float(jnp.max(jnp.abs(out - ref)))
    assert err < 1e-2, f"max abs error vs reference: {err}"   # bf16-operand tolerance
    print("KERNEL_OK")
</pallas_src>

<mosaic_0001>
module attributes {stable_mosaic.version = 11 : i64} {
  func.func @embeddings_kernel(%arg0: i32, %arg1: memref<16x128xbf16, #tpu.memory_space<vmem>>, %arg2: memref<128x128xbf16, #tpu.memory_space<vmem>>, %arg3: memref<16x2xi32, #tpu.memory_space<vmem>>, %arg4: memref<20x128xbf16, #tpu.memory_space<vmem>>, %arg5: memref<16x128xf32, #tpu.memory_space<vmem>>) attributes {dimension_semantics = [#tpu.dimension_semantics<parallel>], iteration_bounds = array<i64: 1>, scalar_prefetch = 0 : i64, scratch_operands = 0 : i64, tpu.core_type = #tpu.core_type<tc>, window_params = [{transform_indices = @transform_0, window_bounds = array<i64: 16, 128>}, {pipeline_mode = #tpu.pipeline_mode<synchronous>, transform_indices = @transform_1, window_bounds = array<i64: 128, 128>}, {transform_indices = @transform_2, window_bounds = array<i64: 16, 2>}, {pipeline_mode = #tpu.pipeline_mode<synchronous>, transform_indices = @transform_3, window_bounds = array<i64: 20, 128>}, {transform_indices = @transform_4, window_bounds = array<i64: 16, 128>}]} {
    %c0 = arith.constant 0 : index
    %c0_0 = arith.constant 0 : index
    %0 = vector.load %arg1[%c0, %c0_0] : memref<16x128xbf16, #tpu.memory_space<vmem>>, vector<16x128xbf16>
    %c0_1 = arith.constant 0 : index
    %c0_2 = arith.constant 0 : index
    %1 = vector.load %arg2[%c0_1, %c0_2] : memref<128x128xbf16, #tpu.memory_space<vmem>>, vector<128x128xbf16>
    %cst = arith.constant dense<0.000000e+00> : vector<16x128xf32>
    %2 = tpu.matmul %0, %1, %cst {dimension_numbers = #tpu.dot_dimension_numbers<[1], [0], [0], [1], [0, 0, 1, 1], [], []>} : vector<16x128xbf16>, vector<128x128xbf16>, vector<16x128xf32> -> vector<16x128xf32>
    %c0_3 = arith.constant 0 : index
    %c0_4 = arith.constant 0 : index
    %3 = vector.load %arg3[%c0_3, %c0_4] : memref<16x2xi32, #tpu.memory_space<vmem>>, vector<16x1xi32>
    %c0_5 = arith.constant 0 : index
    %c1 = arith.constant 1 : index
    %4 = vector.load %arg3[%c0_5, %c1] : memref<16x2xi32, #tpu.memory_space<vmem>>, vector<16x1xi32>
    %5 = tpu.iota {dimensions = array<i32: 1>} : vector<16x20xi32>
    %6 = vector.broadcast %3 : vector<16x1xi32> to vector<16x20xi32>
    %7 = arith.cmpi eq, %6, %5 : vector<16x20xi32>
    %8 = vector.broadcast %4 : vector<16x1xi32> to vector<16x20xi32>
    %9 = arith.cmpi eq, %8, %5 : vector<16x20xi32>
    %10 = arith.ori %7, %9 : vector<16x20xi1>
    %11 = arith.extui %10 : vector<16x20xi1> to vector<16x20xi32>
    %12 = arith.sitofp %11 : vector<16x20xi32> to vector<16x20xf32>
    %13 = arith.truncf %12 : vector<16x20xf32> to vector<16x20xbf16>
    %c0_6 = arith.constant 0 : index
    %c0_7 = arith.constant 0 : index
    %14 = vector.load %arg4[%c0_6, %c0_7] : memref<20x128xbf16, #tpu.memory_space<vmem>>, vector<20x128xbf16>
    %cst_8 = arith.constant dense<0.000000e+00> : vector<16x128xf32>
    %15 = tpu.matmul %13, %14, %cst_8 {dimension_numbers = #tpu.dot_dimension_numbers<[1], [0], [0], [1], [0, 0, 1, 1], [], []>} : vector<16x20xbf16>, vector<20x128xbf16>, vector<16x128xf32> -> vector<16x128xf32>
    %16 = arith.addf %2, %15 : vector<16x128xf32>
    %c0_9 = arith.constant 0 : index
    %c0_10 = arith.constant 0 : index
    %17 = vector.load %arg5[%c0_9, %c0_10] : memref<16x128xf32, #tpu.memory_space<vmem>>, vector<16x128xf32>
    tpu.vector_store %arg5[%c0_9, %c0_10], %16 {strides = array<i32>} : memref<16x128xf32, #tpu.memory_space<vmem>>, vector<16x128xf32>,
    return
  }
  func.func @transform_0(%arg0: i32) -> (i32, i32) {
    %c0_i32 = arith.constant 0 : i32
    %c0_i32_0 = arith.constant 0 : i32
    return %arg0, %c0_i32 : i32, i32
  }
  func.func @transform_1(%arg0: i32) -> (i32, i32) {
    %c0_i32 = arith.constant 0 : i32
    %c0_i32_0 = arith.constant 0 : i32
    %c0_i32_1 = arith.constant 0 : i32
    return %c0_i32, %c0_i32_0 : i32, i32
  }
  func.func @transform_2(%arg0: i32) -> (i32, i32) {
    %c0_i32 = arith.constant 0 : i32
    %c0_i32_0 = arith.constant 0 : i32
    return %arg0, %c0_i32 : i32, i32
  }
  func.func @transform_3(%arg0: i32) -> (i32, i32) {
    %c0_i32 = arith.constant 0 : i32
    %c0_i32_0 = arith.constant 0 : i32
    %c0_i32_1 = arith.constant 0 : i32
    return %c0_i32, %c0_i32_0 : i32, i32
  }
  func.func @transform_4(%arg0: i32) -> (i32, i32) {
    %c0_i32 = arith.constant 0 : i32
    %c0_i32_0 = arith.constant 0 : i32
    return %arg0, %c0_i32 : i32, i32
  }
}

</mosaic_0001>

<bundles_post_ra>
// kernel: embeddings_forward.1
= control target key start
LH: loop header
LB: loop body
LE: loop exit
PB: predicated region body
PF: predicated region fallthrough
CT: control target
= control target key end

     0   :  { %v297_v0 = vmov 1   ;;  %v298_v1 = vmov 0   ;;  %v299_v5 = vmov 0.0   ;;  %vm300_vm0 = vmmov 0   ;;  %s371_s2 = inlined_call_operand.vmem [shape: s32[16,2], index: 2, kind: input, shape index: {}]   ;;  %s372_s1 = inlined_call_operand.vmem [shape: bf16[128,128], index: 1, kind: input, shape index: {}]   ;;  %s373_s3 = inlined_call_operand.vmem [shape: bf16[20,128], index: 3, kind: input, shape index: {}]   ;;  %s374_s0 = inlined_call_operand.vmem [shape: bf16[16,128], index: 0, kind: input, shape index: {}]   ;;  %s375_s4 = inlined_call_operand.vmem [shape: f32[16,128], index: 4, kind: output, shape index: {}]  }
   0x1   :  { %284 = vset.pattern.permute.xlu1 %v297_v0  ;;  %283 = vset.pattern.permute.xlu0 %v298_v1  ;;  %v36_v2 = vld [vmem:[%s371_s2] sm:$0xff]  ;;  %v286_v3 = vld [vmem:[%s372_s1 + $0x38] sm:$0xff]   ;;  %v37_v4 = vld [vmem:[%s371_s2 + $0x8] sm:$0xff]  ;;  %vm79_vm1 = vcmask 1041408   ;;  %v38_v17 = vlaneseq  ;;  %vm75_vm8 = vcmask 162816  }
   0x2   :  { %49 = vperm.xlu1 %284, %v36_v2   ;;  %41 = vperm.xlu0 %283, %v36_v2   ;;  %v287_v6 = vld [vmem:[%s372_s1 + $0x30] sm:$0xff]   ;;  %v288_v7 = vld [vmem:[%s372_s1 + $0x28] sm:$0xff]   ;;  %v289_v9 = vld [vmem:[%s372_s1 + $0x20] sm:$0xff]  }
   0x3   :  { %259 = vmatprep.subr.bf16.mxu1 %v299_v5  ;;  %251 = vmatprep.subr.bf16.mxu0 %v299_v5  ;;  %v294_v8 = vld [vmem:[%s373_s3 + $0x8] ss:$0 sps:$4 sm:$0x33]   ;;  %v296_v11 = vld [vmem:[%s373_s3] sm:$0xff]   ;;  %v290_v12 = vld [vmem:[%s372_s1 + $0x18] sm:$0xff]   ;;  %v39_v18 = vand.u32 127, %v38_v17 }
   0x4   :  { %260 = vmatpush3.bf16.msra.mxu1 %v286_v3  ;;  %275 = vmatprep.mubr.msk.bf16.mxu1 %vm300_vm0, %v299_v5  ;;  %v81_v10 = vsel %vm79_vm1, %v294_v8, 0  ;;  %v291_v13 = vld [vmem:[%s372_s1 + $0x10] sm:$0xff]   ;;  %v292_v14 = vld [vmem:[%s372_s1 + $0x8] sm:$0xff]   ;;  %v293_v15 = vld [vmem:[%s372_s1] sm:$0xff]  }
   0x5   :  { %261 = vmatprep.subr.bf16.mxu1 %v299_v5  ;;  %255 = vmatprep.mubr.msk.bf16.mxu0 %vm300_vm0, %v299_v5  ;;  %v295_v16 = vld [vmem:[%s374_s0] sm:$0xff]  }
   0x6   :  { %52 = vperm.xlu1 %284, %v37_v4   ;;  %44 = vperm.xlu0 %283, %v37_v4  }
   0x7   :  { %252 = vmatpush3.bf16.msra.mxu0 %v81_v10 }
   0x8   :  { %262 = vmatpush3.bf16.msra.mxu1 %v287_v6  ;;  %253 = vmatprep.subr.bf16.mxu0 %v299_v5 }
   0x9   :  { %263 = vmatprep.subr.bf16.mxu1 %v299_v5 }
   0xa   :  { %285 = vset.pattern.permute.xlu0 %v297_v0 }
   0xb   :  { %254 = vmatpush3.bf16.msra.mxu0 %v296_v11 }
   0xc   :  { %264 = vmatpush3.bf16.msra.mxu1 %v288_v7 }
   0xd   :  { %265 = vmatprep.subr.bf16.mxu1 %v299_v5 }
  0x10   :  { %266 = vmatpush3.bf16.msra.mxu1 %v289_v9 }
  0x11   :  { %267 = vmatprep.subr.bf16.mxu1 %v299_v5 }
  0x14   :  { %268 = vmatpush3.bf16.msra.mxu1 %v290_v12 }
  0x15   :  { %269 = vmatprep.subr.bf16.mxu1 %v299_v5 }
  0x18   :  { %270 = vmatpush3.bf16.msra.mxu1 %v291_v13 }
  0x19   :  { %271 = vmatprep.subr.bf16.mxu1 %v299_v5 }
  0x1c   :  { %272 = vmatpush3.bf16.msra.mxu1 %v292_v14 }
  0x1d   :  { %273 = vmatprep.subr.bf16.mxu1 %v299_v5 }
  0x20   :  { %274 = vmatpush3.bf16.msra.mxu1 %v293_v15 }
  0x23   :  { %276 = vmatmul.mubr.bf16.vlgmr.msra.gmra.mxu1 %v295_v16 }
  0x7d   :  { %v50_v19 = vpop.permute.xlu1 %49  ;;  %v42_v20 = vpop.permute.xlu0 %41 }
  0x7e   :  { %vm54_vm2 = vcmp.eq.s32.totalorder %v50_v19, %v39_v18  ;;  %vm46_vm3 = vcmp.eq.s32.totalorder %v42_v20, %v39_v18 }
  0x7f   :  { %vm56_vm4 = vmor %vm46_vm3, %vm54_vm2 }
  0x80   :  { %v225_v23 = vsel %vm56_vm4, 1.0, %v299_v5 }
  0x81   :  { %v53_v21 = vpop.permute.xlu1 %52  ;;  %v45_v22 = vpop.permute.xlu0 %44 }
  0x82   :  { %vm55_vm5 = vcmp.eq.s32.totalorder %v53_v21, %v39_v18  ;;  %vm47_vm6 = vcmp.eq.s32.totalorder %v45_v22, %v39_v18 }
  0x83   :  { %vm57_vm7 = vmor %vm47_vm6, %vm55_vm5 }
  0x84   :  { %v226_v24 = vsel %vm57_vm7, 1.0, %v299_v5 }
  0x85   :  { %v62_v25 = vpack.c.bf16 %v226_v24, %v225_v23 }
  0x87   :  { %256 = vmatmul.mubr.msk.bf16.vlgmr.msra.gmra.mxu0 %vm75_vm8, %v62_v25 }
  0xe3   :  { %v212_v26 = vpop.f32.mrf.mxu1 }
  0xe5   :  { %v277_v27 = vpop.f32.mrf.mxu1 }
  0xe7   :  { %v215_v28 = vpop.f32.mrf.mxu1 }
  0xe9   :  { %v278_v29 = vpop.f32.mrf.mxu1 }
 0x147   :  { %v117_v30 = vpop.f32.mrf.mxu0 }
 0x148   :  { %v213_v31 = vadd.f32 %v212_v26, %v117_v30 }
 0x149   :  { %v257_v32 = vpop.f32.mrf.mxu0 }
 0x14a   :  { %219 = vst [vmem:[%s375_s4] sm:$0xff] %v213_v31 }
 0x14b   :  { %v120_v33 = vpop.f32.mrf.mxu0 }
 0x14c   :  { %v216_v34 = vadd.f32 %v215_v28, %v120_v33 }
 0x14d   :  { %v258_v35 = vpop.f32.mrf.mxu0 }
 0x14e   :  { %220 = vst [vmem:[%s375_s4 + $0x8] sm:$0xff] %v216_v34 }

</bundles_post_ra>
